<compile_context>
chip_gen: v7x
topology: tpu7x:2x2x1
jax: 0.10.0
libtpu: 0.0.40
codegen_flags: <defaults>
</compile_context>

<pallas_src>
import functools
import math

import jax
import jax.numpy as jnp
from jax import lax
from jax.experimental import pallas as pl
from jax.experimental.pallas import tpu as pltpu


def _round_up(x, m):
    return ((x + m - 1) // m) * m


def _pick_row_tile(two_b, target=256):
    """Row-strip height: multiple of 8, >=2 strips when possible (megacore),
    MXU-friendly (256/128) for large batches, preferring an even strip count."""
    if two_b <= 2 * target:
        return max(8, _round_up((two_b + 1) // 2, 8))
    for t in (target, target // 2):
        if -(-two_b // t) % 2 == 0:
            return t
    return target


def _plan_tiles(two_b, dim, feats_itemsize, vmem_cap, row_tile=None, col_tile=None):
    """Pick (row_tile, col_tile, padded_row_count, vmem_estimate_bytes)."""
    row_t = max(8, _round_up(int(row_tile), 8)) if row_tile else _pick_row_tile(two_b)
    budget = max(8 << 20, int(0.40 * vmem_cap))

    def footprint(r_t, c_t, n_col_steps):
        rhs = (1 if n_col_steps == 1 else 2) * c_t * dim * feats_itemsize  # 1 buf if resident
        lhs = 2 * r_t * dim * feats_itemsize                               # double-buffered strip
        strip = 6 * r_t * _round_up(c_t, 128) * 4                          # sim/neg/mask f32 temps
        small = 12 * r_t * 128 * 4 + 4 * 8 * 128 * 4                       # (tile,1) refs + outputs
        return rhs + lhs + strip + small

    if col_tile:                                                 # explicit override
        col_t = max(8, _round_up(int(col_tile), 8))
        pad = _round_up(two_b, math.lcm(row_t, col_t))
        return row_t, col_t, pad, footprint(row_t, col_t, pad // col_t)

    full = _round_up(two_b, row_t)
    est = footprint(row_t, full, 1)
    if est <= budget:                                            # feats resident, 1 column step
        return row_t, full, full, est

    # Large-B path: stream RHS column blocks; power-of-two-ish tiles so both
    # the row and column tiles divide the padded row count.
    if row_tile is None:
        row_t = 256 if two_b >= 512 else max(row_t, 128)
    cap_cols = _round_up(two_b, row_t)
    chosen = 128
    for col_t in (2048, 1024, 512, 256, 128):
        if col_t > cap_cols:
            continue
        pad = _round_up(two_b, math.lcm(row_t, col_t))
        if footprint(row_t, col_t, pad // col_t) <= budget:
            chosen = col_t
            break
    pad = _round_up(two_b, math.lcm(row_t, chosen))
    return row_t, chosen, pad, footprint(row_t, chosen, pad // chosen)


def _hardcon_kernel(cnt_ref, lhs_ref, rhs_ref, posmask_ref, poslog_ref,
                    out_ref, sumneg_ref, sumsq_ref, *,
                    batch_size, two_b, two_b_pad, row_tile, col_tile, inv_temp,
                    contrast_type, matmul_dtype, exp_dtype):
    """One (row strip, column strip) block of the HardConLoss computation.

    cnt_ref     : (n_row_tiles,) int32 in SMEM — positives per row strip (prefetch)
    lhs_ref     : (row_tile, D)  this strip's rows of feats
    rhs_ref     : (col_tile, D)  this column block of feats
    posmask_ref : (row_tile, 1)  1.0 where pairsimi == 1 else 0.0
    poslog_ref  : (row_tile, 1)  exact f32 positive logit  f1.f2 / T
    out_ref     : (8, 128)       per-strip partials: lane 0 = num, lane 1 = den
    sumneg_ref  : (row_tile, 1)  running sum(neg)   across column strips
    sumsq_ref   : (row_tile, 1)  running sum(neg^2) across column strips (HardNeg)
    """
    i = pl.program_id(0)                 # row strip   ("parallel")
    k = pl.program_id(1)                 # column strip ("arbitrary" reduction)
    last_k = pl.num_programs(1) - 1
    has_pos = cnt_ref[i] > 0             # strip with no positives contributes nothing

    @pl.when(has_pos)
    def _accumulate():
        @pl.when(k == 0)
        def _():
            sumneg_ref[...] = jnp.zeros_like(sumneg_ref)
            if contrast_type == 'HardNeg':
                sumsq_ref[...] = jnp.zeros_like(sumsq_ref)

        # sim[r, c] = feats[i*row_tile + r] . feats[k*col_tile + c] / T
        # NT contraction straight on the MXU; 1/T folded into the LHS strip.
        lhs = lhs_ref[...].astype(jnp.float32) * inv_temp
        if matmul_dtype is not None:
            lhs = lhs.astype(matmul_dtype)
            rhs = rhs_ref[...].astype(matmul_dtype)
        else:
            rhs = rhs_ref[...].astype(jnp.float32)
        sim = lax.dot_general(lhs, rhs, (((1,), (1,)), ((), ())),
                              preferred_element_type=jnp.float32)  # (row_tile, col_tile)

        # Keep-mask from a single |col - row|: drops self + positive-pair
        # columns (and any zero-padded tail columns).
        rows = lax.broadcasted_iota(jnp.int32, sim.shape, 0) + i * row_tile
        cols = lax.broadcasted_iota(jnp.int32, sim.shape, 1) + k * col_tile
        adiff = jnp.abs(cols - rows)
        keep = (adiff != 0) & (adiff != batch_size)
        if two_b_pad != two_b:
            keep = keep & (cols < two_b)

        if exp_dtype is not None:        # optional bf16 EUP path (v6e/v7x only)
            neg = jnp.exp(sim.astype(exp_dtype)).astype(jnp.float32)
        else:
            neg = jnp.exp(sim)
        neg = jnp.where(keep, neg, 0.0)

        sumneg_ref[...] += jnp.sum(neg, axis=-1, keepdims=True)
        if contrast_type == 'HardNeg':
            sumsq_ref[...] += jnp.sum(neg * neg, axis=-1, keepdims=True)

    @pl.when(jnp.logical_and(k == last_k, has_pos))
    def _finalize():
        pm = posmask_ref[...].astype(jnp.float32)       # (row_tile, 1)
        s_pos = poslog_ref[...].astype(jnp.float32)     # log(pos), exact f32
        pos = jnp.exp(s_pos)
        sum_neg = sumneg_ref[...]
        if contrast_type == 'Orig':
            ng = sum_neg
        else:
            # torch: negimp = neg.log().exp() == neg exactly, so
            # Ng = sum(neg^2) / (sum(neg) / (2B - 2)) — no transcendental round-trip.
            ng = sumsq_ref[...] * jnp.float32(two_b - 2) / sum_neg
        # -log(pos / (Ng + pos)) == log(Ng + pos) - log(pos)
        per_row = pm * (jnp.log(ng + pos) - s_pos)
        num_p = jnp.sum(per_row)
        den_p = jnp.sum(pm)
        lane = lax.broadcasted_iota(jnp.int32, out_ref.shape, 1)
        out_ref[...] = jnp.where(lane == 0, num_p,
                                 jnp.where(lane == 1, den_p, 0.0))

    @pl.when(jnp.logical_and(k == last_k, jnp.logical_not(has_pos)))
    def _skip():
        out_ref[...] = jnp.zeros_like(out_ref)


def hardcon_loss(features_1, features_2, pairsimi, temperature=0.07,
                 contrast_type='HardNeg', row_tile=None, col_tile=None,
                 feats_dtype=None, matmul_dtype=None, exp_dtype=None):
    """JAX/Pallas equivalent of HardConLoss.forward.

    Notes:
      * posmask.sum() == 0 yields 0/0 = NaN, matching the PyTorch reference.
      * No max-subtraction before exp (same as torch): inputs are expected to
        be L2-normalized so exp(sim/T) <= e^{1/T} stays finite in f32.
      * feats_dtype / matmul_dtype / exp_dtype = jnp.bfloat16 are optional
        memory / MXU / EUP levers for v6e/v7x; defaults keep exact f32.
    """
    if contrast_type not in ('Orig', 'HardNeg'):
        raise ValueError("contrast_type must be 'Orig' or 'HardNeg'")
    batch_size, dim = features_1.shape
    two_b = 2 * batch_size

    f1 = features_1.astype(jnp.float32)
    f2 = features_2.astype(jnp.float32)
    feats = jnp.concatenate([f1, f2], axis=0)                      # (2B, D)
    if feats_dtype is not None:
        feats = feats.astype(feats_dtype)                          # e.g. bf16 residency
    # Exact f32 positive logit (tiny O(2B*D) work, mirrors the torch code).
    pos_logit = jnp.sum(f1 * f2, axis=-1) / temperature            # (B,)
    pos_logit = jnp.concatenate([pos_logit, pos_logit], axis=0)    # (2B,)
    pairmask = jnp.concatenate([pairsimi, pairsimi], axis=0)       # (2B,)
    posmask = (pairmask == 1).astype(jnp.float32)                  # (2B,)

    try:
        vmem_cap = int(pltpu.get_tpu_info().vmem_capacity_bytes)   # generation-aware
    except Exception:
        vmem_cap = 64 << 20                                        # conservative fallback
    itemsize = jnp.dtype(feats.dtype).itemsize
    row_t, col_t, two_b_pad, est = _plan_tiles(two_b, dim, itemsize, vmem_cap,
                                               row_tile=row_tile, col_tile=col_tile)
    n_i = two_b_pad // row_t
    n_k = two_b_pad // col_t

    pad = two_b_pad - two_b
    if pad:
        feats = jnp.pad(feats, ((0, pad), (0, 0)))
        posmask = jnp.pad(posmask, (0, pad))
        pos_logit = jnp.pad(pos_logit, (0, pad))
    # Per-strip positive counts (scalar prefetch): all-negative strips skip
    # their matmul + exp inside the kernel.
    counts = (posmask.reshape(n_i, row_t).sum(axis=1) > 0).astype(jnp.int32)
    posmask = posmask.reshape(two_b_pad, 1)
    pos_logit = pos_logit.reshape(two_b_pad, 1).astype(jnp.float32)

    kernel = functools.partial(
        _hardcon_kernel, batch_size=batch_size, two_b=two_b, two_b_pad=two_b_pad,
        row_tile=row_t, col_tile=col_t, inv_temp=float(1.0 / temperature),
        contrast_type=contrast_type, matmul_dtype=matmul_dtype, exp_dtype=exp_dtype)

    # RHS column blocks: fully resident (constant block index) when one column
    # step covers all rows -> single-buffer it so it is not duplicated in VMEM;
    # otherwise streamed with the default double buffer.
    if n_k == 1:
        rhs_spec = pl.BlockSpec((col_t, dim), lambda i, k, cnt: (k, 0),
                                pipeline_mode=pl.Buffered(1))
    else:
        rhs_spec = pl.BlockSpec((col_t, dim), lambda i, k, cnt: (k, 0))

    vmem_limit = int(min(int(0.85 * vmem_cap), max(32 << 20, 2 * est)))

    out = pl.pallas_call(
        kernel,
        out_shape=jax.ShapeDtypeStruct((n_i * 8, 128), jnp.float32),
        grid_spec=pltpu.PrefetchScalarGridSpec(
            num_scalar_prefetch=1,
            grid=(n_i, n_k),
            in_specs=[
                pl.BlockSpec((row_t, dim), lambda i, k, cnt: (i, 0)),  # LHS row strip
                rhs_spec,                                              # RHS column strip
                pl.BlockSpec((row_t, 1), lambda i, k, cnt: (i, 0)),    # posmask strip
                pl.BlockSpec((row_t, 1), lambda i, k, cnt: (i, 0)),    # exact log(pos) strip
            ],
            out_specs=pl.BlockSpec((8, 128), lambda i, k, cnt: (i, 0)),
            scratch_shapes=[pltpu.VMEM((row_t, 1), jnp.float32),       # running sum(neg)
                            pltpu.VMEM((row_t, 1), jnp.float32)],      # running sum(neg^2)
        ),
        compiler_params=pltpu.CompilerParams(
            dimension_semantics=("parallel", "arbitrary"),
            vmem_limit_bytes=vmem_limit,
        ),
    )(counts, feats, feats, posmask, pos_logit)

    part = out.reshape(n_i, 8, 128)
    num = jnp.sum(part[:, 0, 0])
    den = jnp.sum(part[:, 0, 1])      # == posmask.sum(); 0/0 -> NaN like torch
    return {'instdisc_loss': num / den}


def _reference(features_1, features_2, pairsimi, temperature=0.07,
               contrast_type='HardNeg'):
    """Pure-JAX reference mirroring the torch code."""
    b = features_1.shape[0]
    feats = jnp.concatenate([features_1, features_2], axis=0)
    mask = ~jnp.tile(jnp.eye(b, dtype=bool), (2, 2))
    pos = jnp.exp(jnp.sum(features_1 * features_2, axis=-1) / temperature)
    pos = jnp.concatenate([pos, pos], axis=0)
    neg = jnp.exp(feats @ feats.T / temperature)
    negm = jnp.where(mask, neg, 0.0)
    pairmask = jnp.concatenate([pairsimi, pairsimi], axis=0)
    posmask = (pairmask == 1).astype(jnp.float32)
    if contrast_type == 'Orig':
        ng = negm.sum(-1)
    else:
        imp = jnp.where(mask, jnp.exp(jnp.log(neg)), 0.0)
        ng = (imp * negm).sum(-1) / (imp.sum(-1) / (2 * b - 2))
    return (-posmask * jnp.log(pos / (ng + pos))).sum() / posmask.sum()


if __name__ == "__main__":
    def make_inputs(B, D, key):
        k1, k2 = jax.random.split(key)
        f1 = jax.random.normal(k1, (B, D), dtype=jnp.float32)
        f2 = jax.random.normal(k2, (B, D), dtype=jnp.float32)
        f1 = f1 / jnp.linalg.norm(f1, axis=-1, keepdims=True)
        f2 = f2 / jnp.linalg.norm(f2, axis=-1, keepdims=True)
        return f1, f2

    # Case 1: B=8, D=32 — auto plan (resident RHS, single column step, Buffered(1)).
    f1, f2 = make_inputs(8, 32, jax.random.PRNGKey(0))
    pairsimi = jnp.array([1, -1, 1, 1, -1, 1, -1, 1], dtype=jnp.int32)
    for ctype in ('HardNeg', 'Orig'):
        loss = hardcon_loss(f1, f2, pairsimi, 0.07, ctype)['instdisc_loss']
        jax.block_until_ready(loss)
        ref = _reference(f1, f2, pairsimi, 0.07, ctype)
        assert jnp.allclose(loss, ref, rtol=1e-3, atol=1e-4), ("auto", ctype, loss, ref)

    # Case 2: forced column streaming (exercises the k-accumulation path).
    for ctype in ('HardNeg', 'Orig'):
        loss = hardcon_loss(f1, f2, pairsimi, 0.07, ctype,
                            row_tile=8, col_tile=8)['instdisc_loss']
        jax.block_until_ready(loss)
        ref = _reference(f1, f2, pairsimi, 0.07, ctype)
        assert jnp.allclose(loss, ref, rtol=1e-3, atol=1e-4), ("stream", ctype, loss, ref)

    # Case 3: B=6 — row/column padding plus one all-negative strip (skip path).
    f1b, f2b = make_inputs(6, 32, jax.random.PRNGKey(1))
    pairsimi_b = jnp.array([1, 1, -1, -1, -1, -1], dtype=jnp.int32)
    for ctype in ('HardNeg', 'Orig'):
        loss = hardcon_loss(f1b, f2b, pairsimi_b, 0.07, ctype)['instdisc_loss']
        jax.block_until_ready(loss)
        ref = _reference(f1b, f2b, pairsimi_b, 0.07, ctype)
        assert jnp.allclose(loss, ref, rtol=1e-3, atol=1e-4), ("pad", ctype, loss, ref)

    print("KERNEL_OK")
</pallas_src>

<mosaic_0001>
module attributes {stable_mosaic.version = 11 : i64} {
  func.func @_hardcon_kernel(%arg0: i32, %arg1: i32, %arg2: memref<2xi32, #tpu.memory_space<smem>>, %arg3: memref<8x32xf32, #tpu.memory_space<vmem>>, %arg4: memref<16x32xf32, #tpu.memory_space<vmem>>, %arg5: memref<8x1xf32, #tpu.memory_space<vmem>>, %arg6: memref<8x1xf32, #tpu.memory_space<vmem>>, %arg7: memref<8x128xf32, #tpu.memory_space<vmem>>, %arg8: memref<8x1xf32, #tpu.memory_space<vmem>>, %arg9: memref<8x1xf32, #tpu.memory_space<vmem>>) attributes {dimension_semantics = [#tpu.dimension_semantics<parallel>, #tpu.dimension_semantics<arbitrary>], iteration_bounds = array<i64: 2, 1>, scalar_prefetch = 1 : i64, scratch_operands = 2 : i64, tpu.core_type = #tpu.core_type<tc>, window_params = [{transform_indices = @transform_0, window_bounds = array<i64: 8, 32>}, {pipeline_mode = #tpu.pipeline_mode<synchronous>, transform_indices = @transform_1, window_bounds = array<i64: 16, 32>}, {transform_indices = @transform_2, window_bounds = array<i64: 8, 1>}, {transform_indices = @transform_3, window_bounds = array<i64: 8, 1>}, {transform_indices = @transform_4, window_bounds = array<i64: 8, 128>}]} {
    %0 = arith.index_cast %arg0 : i32 to index
    %1 = memref.load %arg2[%0] : memref<2xi32, #tpu.memory_space<smem>>
    %c0_i32 = arith.constant 0 : i32
    %2 = arith.cmpi sgt, %1, %c0_i32 : i32
    %3 = arith.extui %2 : i1 to i32
    %c0_i32_0 = arith.constant 0 : i32
    %4 = arith.cmpi ne, %3, %c0_i32_0 : i32
    scf.if %4 {
      %c0_i32_5 = arith.constant 0 : i32
      %14 = arith.cmpi eq, %arg1, %c0_i32_5 : i32
      %15 = arith.extui %14 : i1 to i32
      %c0_i32_6 = arith.constant 0 : i32
      %16 = arith.cmpi ne, %15, %c0_i32_6 : i32
      scf.if %16 {
        %cst_24 = arith.constant 0.000000e+00 : f32
        %51 = vector.broadcast %cst_24 : f32 to vector<8x1xf32>
        %c0_25 = arith.constant 0 : index
        %c0_26 = arith.constant 0 : index
        %52 = vector.load %arg8[%c0_25, %c0_26] : memref<8x1xf32, #tpu.memory_space<vmem>>, vector<8x1xf32>
        tpu.vector_store %arg8[%c0_25, %c0_26], %51 {strides = array<i32>} : memref<8x1xf32, #tpu.memory_space<vmem>>, vector<8x1xf32>,
        %cst_27 = arith.constant 0.000000e+00 : f32
        %53 = vector.broadcast %cst_27 : f32 to vector<8x1xf32>
        %c0_28 = arith.constant 0 : index
        %c0_29 = arith.constant 0 : index
        %54 = vector.load %arg9[%c0_28, %c0_29] : memref<8x1xf32, #tpu.memory_space<vmem>>, vector<8x1xf32>
        tpu.vector_store %arg9[%c0_28, %c0_29], %53 {strides = array<i32>} : memref<8x1xf32, #tpu.memory_space<vmem>>, vector<8x1xf32>,
      } else {
      }
      %c0 = arith.constant 0 : index
      %c0_7 = arith.constant 0 : index
      %17 = vector.load %arg3[%c0, %c0_7] : memref<8x32xf32, #tpu.memory_space<vmem>>, vector<8x32xf32>
      %cst = arith.constant 14.2857141 : f32
      %18 = vector.broadcast %cst : f32 to vector<8x32xf32>
      %19 = arith.mulf %17, %18 : vector<8x32xf32>
      %c0_8 = arith.constant 0 : index
      %c0_9 = arith.constant 0 : index
      %20 = vector.load %arg4[%c0_8, %c0_9] : memref<16x32xf32, #tpu.memory_space<vmem>>, vector<16x32xf32>
      %cst_10 = arith.constant dense<0.000000e+00> : vector<8x16xf32>
      %21 = tpu.matmul %19, %20, %cst_10 {dimension_numbers = #tpu.dot_dimension_numbers<[1], [1], [0], [0], [0, 0, 1, 0], [], []>} : vector<8x32xf32>, vector<16x32xf32>, vector<8x16xf32> -> vector<8x16xf32>
      %22 = tpu.iota {dimensions = array<i32: 0>} : vector<8x16xi32>
      %c8_i32 = arith.constant 8 : i32
      %23 = arith.muli %arg0, %c8_i32 : i32
      %24 = vector.broadcast %23 : i32 to vector<8x16xi32>
      %25 = arith.addi %22, %24 : vector<8x16xi32>
      %26 = tpu.iota {dimensions = array<i32: 1>} : vector<8x16xi32>
      %c16_i32 = arith.constant 16 : i32
      %27 = arith.muli %arg1, %c16_i32 : i32
      %28 = vector.broadcast %27 : i32 to vector<8x16xi32>
      %29 = arith.addi %26, %28 : vector<8x16xi32>
      %30 = arith.subi %29, %25 : vector<8x16xi32>
      %31 = math.absi %30 : vector<8x16xi32>
      %c0_i32_11 = arith.constant 0 : i32
      %32 = vector.broadcast %c0_i32_11 : i32 to vector<8x16xi32>
      %33 = arith.cmpi ne, %31, %32 : vector<8x16xi32>
      %c8_i32_12 = arith.constant 8 : i32
      %34 = vector.broadcast %c8_i32_12 : i32 to vector<8x16xi32>
      %35 = arith.cmpi ne, %31, %34 : vector<8x16xi32>
      %36 = arith.andi %33, %35 : vector<8x16xi1>
      %37 = math.exp %21 : vector<8x16xf32>
      %cst_13 = arith.constant 0.000000e+00 : f32
      %38 = vector.broadcast %cst_13 : f32 to vector<8x16xf32>
      %39 = arith.select %36, %37, %38 : vector<8x16xi1>, vector<8x16xf32>
      %c0_14 = arith.constant 0 : index
      %c0_15 = arith.constant 0 : index
      %40 = vector.load %arg8[%c0_14, %c0_15] : memref<8x1xf32, #tpu.memory_space<vmem>>, vector<8x1xf32>
      %cst_16 = arith.constant dense<0.000000e+00> : vector<8xf32>
      %41 = vector.multi_reduction <add>, %39, %cst_16 [1] : vector<8x16xf32> to vector<8xf32>
      %42 = vector.shape_cast %41 : vector<8xf32> to vector<8x1xf32>
      %43 = arith.addf %40, %42 : vector<8x1xf32>
      %c0_17 = arith.constant 0 : index
      %c0_18 = arith.constant 0 : index
      %44 = vector.load %arg8[%c0_17, %c0_18] : memref<8x1xf32, #tpu.memory_space<vmem>>, vector<8x1xf32>
      tpu.vector_store %arg8[%c0_17, %c0_18], %43 {strides = array<i32>} : memref<8x1xf32, #tpu.memory_space<vmem>>, vector<8x1xf32>,
      %c0_19 = arith.constant 0 : index
      %c0_20 = arith.constant 0 : index
      %45 = vector.load %arg9[%c0_19, %c0_20] : memref<8x1xf32, #tpu.memory_space<vmem>>, vector<8x1xf32>
      %46 = arith.mulf %39, %39 : vector<8x16xf32>
      %cst_21 = arith.constant dense<0.000000e+00> : vector<8xf32>
      %47 = vector.multi_reduction <add>, %46, %cst_21 [1] : vector<8x16xf32> to vector<8xf32>
      %48 = vector.shape_cast %47 : vector<8xf32> to vector<8x1xf32>
      %49 = arith.addf %45, %48 : vector<8x1xf32>
      %c0_22 = arith.constant 0 : index
      %c0_23 = arith.constant 0 : index
      %50 = vector.load %arg9[%c0_22, %c0_23] : memref<8x1xf32, #tpu.memory_space<vmem>>, vector<8x1xf32>
      tpu.vector_store %arg9[%c0_22, %c0_23], %49 {strides = array<i32>} : memref<8x1xf32, #tpu.memory_space<vmem>>, vector<8x1xf32>,
    } else {
    }
    %c0_i32_1 = arith.constant 0 : i32
    %5 = arith.cmpi eq, %arg1, %c0_i32_1 : i32
    %6 = arith.andi %5, %2 : i1
    %7 = arith.extui %6 : i1 to i32
    %c0_i32_2 = arith.constant 0 : i32
    %8 = arith.cmpi ne, %7, %c0_i32_2 : i32
    scf.if %8 {
      %c0 = arith.constant 0 : index
      %c0_5 = arith.constant 0 : index
      %14 = vector.load %arg5[%c0, %c0_5] : memref<8x1xf32, #tpu.memory_space<vmem>>, vector<8x1xf32>
      %c0_6 = arith.constant 0 : index
      %c0_7 = arith.constant 0 : index
      %15 = vector.load %arg6[%c0_6, %c0_7] : memref<8x1xf32, #tpu.memory_space<vmem>>, vector<8x1xf32>
      %16 = math.exp %15 : vector<8x1xf32>
      %c0_8 = arith.constant 0 : index
      %c0_9 = arith.constant 0 : index
      %17 = vector.load %arg8[%c0_8, %c0_9] : memref<8x1xf32, #tpu.memory_space<vmem>>, vector<8x1xf32>
      %c0_10 = arith.constant 0 : index
      %c0_11 = arith.constant 0 : index
      %18 = vector.load %arg9[%c0_10, %c0_11] : memref<8x1xf32, #tpu.memory_space<vmem>>, vector<8x1xf32>
      %cst = arith.constant 1.400000e+01 : f32
      %19 = vector.broadcast %cst : f32 to vector<8x1xf32>
      %20 = arith.mulf %18, %19 : vector<8x1xf32>
      %21 = arith.divf %20, %17 : vector<8x1xf32>
      %22 = arith.addf %21, %16 : vector<8x1xf32>
      %23 = math.log %22 : vector<8x1xf32>
      %24 = arith.subf %23, %15 : vector<8x1xf32>
      %25 = arith.mulf %14, %24 : vector<8x1xf32>
      %26 = vector.shape_cast %25 : vector<8x1xf32> to vector<1x8x1xf32>
      %cst_12 = arith.constant dense<0.000000e+00> : vector<1xf32>
      %27 = vector.multi_reduction <add>, %26, %cst_12 [1, 2] : vector<1x8x1xf32> to vector<1xf32>
      %28 = vector.shape_cast %27 : vector<1xf32> to vector<1x1x1xf32>
      %29 = vector.extract %28[0, 0, 0] : f32 from vector<1x1x1xf32>
      %30 = vector.shape_cast %14 : vector<8x1xf32> to vector<1x8x1xf32>
      %cst_13 = arith.constant dense<0.000000e+00> : vector<1xf32>
      %31 = vector.multi_reduction <add>, %30, %cst_13 [1, 2] : vector<1x8x1xf32> to vector<1xf32>
      %32 = vector.shape_cast %31 : vector<1xf32> to vector<1x1x1xf32>
      %33 = vector.extract %32[0, 0, 0] : f32 from vector<1x1x1xf32>
      %34 = tpu.iota {dimensions = array<i32: 1>} : vector<8x128xi32>
      %c0_i32_14 = arith.constant 0 : i32
      %35 = vector.broadcast %c0_i32_14 : i32 to vector<8x128xi32>
      %36 = arith.cmpi eq, %34, %35 : vector<8x128xi32>
      %c1_i32 = arith.constant 1 : i32
      %37 = vector.broadcast %c1_i32 : i32 to vector<8x128xi32>
      %38 = arith.cmpi eq, %34, %37 : vector<8x128xi32>
      %cst_15 = arith.constant 0.000000e+00 : f32
      %39 = vector.broadcast %33 : f32 to vector<8x128xf32>
      %40 = vector.broadcast %cst_15 : f32 to vector<8x128xf32>
      %41 = arith.select %38, %39, %40 : vector<8x128xi1>, vector<8x128xf32>
      %42 = vector.broadcast %29 : f32 to vector<8x128xf32>
      %43 = arith.select %36, %42, %41 : vector<8x128xi1>, vector<8x128xf32>
      %c0_16 = arith.constant 0 : index
      %c0_17 = arith.constant 0 : index
      %44 = vector.load %arg7[%c0_16, %c0_17] : memref<8x128xf32, #tpu.memory_space<vmem>>, vector<8x128xf32>
      tpu.vector_store %arg7[%c0_16, %c0_17], %43 {strides = array<i32>} : memref<8x128xf32, #tpu.memory_space<vmem>>, vector<8x128xf32>,
    } else {
    }
    %c0_i32_3 = arith.constant 0 : i32
    %9 = arith.cmpi eq, %arg1, %c0_i32_3 : i32
    %true = arith.constant true
    %10 = arith.xori %2, %true : i1
    %11 = arith.andi %9, %10 : i1
    %12 = arith.extui %11 : i1 to i32
    %c0_i32_4 = arith.constant 0 : i32
    %13 = arith.cmpi ne, %12, %c0_i32_4 : i32
    scf.if %13 {
      %cst = arith.constant 0.000000e+00 : f32
      %14 = vector.broadcast %cst : f32 to vector<8x128xf32>
      %c0 = arith.constant 0 : index
      %c0_5 = arith.constant 0 : index
      %15 = vector.load %arg7[%c0, %c0_5] : memref<8x128xf32, #tpu.memory_space<vmem>>, vector<8x128xf32>
      tpu.vector_store %arg7[%c0, %c0_5], %14 {strides = array<i32>} : memref<8x128xf32, #tpu.memory_space<vmem>>, vector<8x128xf32>,
    } else {
    }
    return
  }
  func.func @transform_0(%arg0: i32, %arg1: i32, %arg2: memref<2xi32, #tpu.memory_space<smem>>) -> (i32, i32) {
    %c0_i32 = arith.constant 0 : i32
    %c0_i32_0 = arith.constant 0 : i32
    return %arg0, %c0_i32 : i32, i32
  }
  func.func @transform_1(%arg0: i32, %arg1: i32, %arg2: memref<2xi32, #tpu.memory_space<smem>>) -> (i32, i32) {
    %c0_i32 = arith.constant 0 : i32
    %c0_i32_0 = arith.constant 0 : i32
    return %arg1, %c0_i32 : i32, i32
  }
  func.func @transform_2(%arg0: i32, %arg1: i32, %arg2: memref<2xi32, #tpu.memory_space<smem>>) -> (i32, i32) {
    %c0_i32 = arith.constant 0 : i32
    %c0_i32_0 = arith.constant 0 : i32
    return %arg0, %c0_i32 : i32, i32
  }
  func.func @transform_3(%arg0: i32, %arg1: i32, %arg2: memref<2xi32, #tpu.memory_space<smem>>) -> (i32, i32) {
    %c0_i32 = arith.constant 0 : i32
    %c0_i32_0 = arith.constant 0 : i32
    return %arg0, %c0_i32 : i32, i32
  }
  func.func @transform_4(%arg0: i32, %arg1: i32, %arg2: memref<2xi32, #tpu.memory_space<smem>>) -> (i32, i32) {
    %c0_i32 = arith.constant 0 : i32
    %c0_i32_0 = arith.constant 0 : i32
    return %arg0, %c0_i32 : i32, i32
  }
}

</mosaic_0001>

<bundles_post_ra>
// kernel: tpu_custom_call.1
= control target key start
LH: loop header
LB: loop body
LE: loop exit
PB: predicated region body
PF: predicated region fallthrough
CT: control target
= control target key end

     0   :  { %s975_s0 = inlined_call_operand.vmem [shape: s32[2], index: 0, kind: input, shape index: {}]   ;;  %s976_s1 = inlined_call_operand.vmem [shape: f32[16,32], index: 1, kind: input, shape index: {}]   ;;  %s977_s2 = inlined_call_operand.vmem [shape: f32[16,32], index: 2, kind: input, shape index: {}]   ;;  %s978_s3 = inlined_call_operand.vmem [shape: f32[16,1], index: 3, kind: input, shape index: {}]   ;;  %s979_s4 = inlined_call_operand.vmem [shape: f32[16,1], index: 4, kind: input, shape index: {}]   ;;  %s980_s5 = inlined_call_operand.hbm [shape: f32[16,128], index: 5, kind: output, shape index: {}]  }
   0x1   :  { %s10_s20 = sshll.u32 %s975_s0, 4  ;;  %s11_s20 = int_to_ptr.vmem [resolvable:$true] %s10_s20 }
   0x2   :  { %s684_s21 = scalar_lea.vmem %s11_s20, 16  ;;  %p689_p1 = scmp.lt.s32.totalorder %s11_s20, %s11_s20 }
   0x3   :  { %p685_p0 = scmp.ne.s32.totalorder %s11_s20, %s684_s21  ;;  %p690_p2 = scmp.lt.s32.totalorder %s684_s21, %s684_s21 }
   0x5   :  { %p691_p3 = por %p690_p2, %p689_p1 }
   0x7   :  { %p692_p4 = pnand %p691_p3, %p685_p0 }
   0x9   :  { %695 = shalt.err (!%p692_p4)  }
   0xa   :  { %s778_s22 = smov [#allocation5]  }
   0xb   :  { %13 = dma.vmem_to_smem %s11_s20, 16, %s778_s22, [#allocation4] }
   0xc   :  { %748 = dma.done.wait [#allocation4], 16 }
   0xd   :  { %749 = vsyncadd [#allocation4], 4294967280 }
   0xe   :  { %15 = sfence }
   0xf   :  { %16 = vsyncpa [#allocation7], 0 }
  0x10   :  { %18 = vsyncpa [#allocation7 + $0x1], 0  ;;  %s817_s23 = smov 0   ;;  %s819_s24 = smov 0  }
  0x11   :  { %s821_s0 = smov 0   ;;  %s823_s25 = smov 0  }
  0x12   :  { %s825_s26 = smov 0   ;;  %s827_s27 = smov 0  }
  0x13 LB: > { %s574_s28 = sadd.s32 4294967295, %s776_s27   ;;  %s575_s29 = sadd.s32 4294967294, %s776_s27   ;;  %s776_s27 = sphi %s827_s27, %s24_s27   ;;  %s772_s26 = sphi %s825_s26, %s987_s26   ;;  %s768_s25 = sphi %s823_s25, %s986_s25   ;;  %s764_s0 = sphi %s821_s0, %s985_s0   ;;  %s760_s24 = sphi %s819_s24, %s984_s24   ;;  %s756_s23 = sphi %s817_s23, %s983_s23  }
  0x14   : > { %s36_s30 = sadd.s32 1, %s772_s26  ;;  %s147_s6 = sadd.s32 1, %s764_s0 }
  0x15   : > { %p38_p5 = scmp.ge.s32.totalorder %s36_s30, 2  ;;  %p157_p6 = scmp.ne.s32.totalorder %s764_s0, %s760_s24 }
  0x16   : > { %p158_p7 = scmp.eq.s32.totalorder %s574_s28, 1  ;;  %p163_p8 = scmp.ne.s32.totalorder %s760_s24, %s756_s23 }
  0x17   : > { %s989_s30 = smov (%p38_p5, %s36_s30), 0  ;;  %p164_p10 = scmp.eq.s32.totalorder %s575_s29, 1 }
  0x18   : > { %p857_p9 = por %p158_p7, %p157_p6  ;;  %s144_s8 = ssub.s32 %s772_s26, %s989_s30 }
  0x19   : > { %p579_p11 = scmp.ge.s32.totalorder %s776_s27, 1  ;;  %p145_p12 = scmp.eq.s32.totalorder %s144_s8, 0 }
  0x1a   : > { %p864_p13 = por %p164_p10, %p163_p8  ;;  %p212_p0 = scmp.lt.s32.totalorder %s776_s27, 3 }
  0x1b   : > { %s870_s10 = scalar_select %p145_p12, %s764_s0, %s147_s6  }
  0x1c   : > { %p213_p1 = pnand %p579_p11, %p212_p0 }
  0x1d   : > { %s247_s11 = sand.u32 (!%p213_p1), 1, %s760_s24   ;;  %p250_p2 = scmp.lt.s32.totalorder (!%p213_p1), %s768_s25, 1 }
  0x1e   : > { %216 = sbr.rel (%p213_p1) target bundleno = 704 (0x2c0), region = 36  ;;  %s580_s12 = sshll.u32 (!%p213_p1), %s247_s11, 3 }
  0x1f   : > { %s877_s13 = sld [smem:[#allocation5 + %s768_s25]] (!%p213_p1)  ;;  %s895_s6 = scalar_lea.vmem (!%p213_p1), [#allocation6], %s580_s12 }
  0x25   : > { %s251_s14 = scalar_select %p250_p2, %s768_s25, 1 }
  0x26   : > { %p269_p3 = scmp.gt.s32.totalorder %s877_s13, 0  ;;  %p584_p4 = scmp.le.s32.totalorder %s877_s13, 0 }
  0x27   : > { %s880_s15 = sshll.u32 %s251_s14, 3  ;;  %v282_v0 = vld [vmem:[%s977_s2] sm:$0xff] (!%p584_p4)  ;;  %v283_v1 = vld [vmem:[%s977_s2 + $0x8] sm:$0xff] (!%p584_p4)  ;;  %vm284_vm0 = vcmask (!%p584_p4), 261120   ;;  %vm277_vm1 = vcmask (!%p584_p4), 7168   ;;  %v779_v2 = vmov (!%p584_p4), 0.0|0.0   ;;  %v364_v7 = vlaneseq (!%p584_p4) }
  0x28   : > { %s253_s18 = scalar_lea.vmem %s976_s1, %s880_s15  ;;  %s263_s21 = scalar_lea.vmem %s978_s3, %s880_s15  ;;  %608 = vmatprep.subr.bf16.mxu0 (!%p584_p4), %v779_v2  ;;  %v609_v3 = vpack.c.bf16 (!%p584_p4), %v283_v1, %v282_v0  ;;  %vm610_vm2 = vmpackc.low (!%p584_p4), %vm284_vm0, %vm284_vm0  ;;  %v780_v4 = vmov (!%p584_p4), 0.0   ;;  %vm781_vm3 = vmmov (!%p584_p4), 0   ;;  %vm385_vm7 = vcmask (!%p584_p4), 130048  }
  0x29   : > { %s267_s29 = scalar_lea.vmem %s979_s4, %s880_s15  ;;  %272 = sbr.rel (%p584_p4) target bundleno = 425 (0x1a9), region = 40  ;;  %278 = vst.msk [vmem:[#allocation2] sm:$0xff] (!%p584_p4), %vm277_vm1, %v780_v4  ;;  %279 = vst.msk [vmem:[#allocation3] sm:$0xff] (!%p584_p4), %vm277_vm1, %v780_v4  ;;  %605 = vmatprep.mubr.msk.f32.mxu0 (!%p584_p4), %vm781_vm3, %v780_v4  ;;  %v280_v5 = vld [vmem:[%s253_s18] sm:$0xff] (!%p584_p4)  ;;  %v365_v8 = vshrl.u32 (!%p584_p4), %v364_v7, 7  ;;  %v370_v11 = vand.u32 (!%p584_p4), 127, %v364_v7 }
  0x2a   : > { %611 = vmatpush3.bf16.xpose.msk.msra.mxu0 (!%p584_p4), %vm610_vm2, %v609_v3  ;;  %v281_v6 = vmul.f32 (!%p584_p4), 14.285714, %v280_v5  ;;  %s588_s12 = sshll.u32 (!%p584_p4), %s768_s25, 3 }
  0x2b   : > { %v367_v9 = vstv (!%p584_p4), %s588_s12 }
  0x2c   : > { %v368_v10 = vadd.s32 (!%p584_p4), %v367_v9, %v365_v8 }
  0x2e   : > { %v374_v12 = vsub.s32 (!%p584_p4), %v370_v11, %v368_v10 }
  0x30   : > { %v376_v14 = vsub.s32 0, %v374_v12  ;;  %v384_v23 = vld [vmem:[#allocation2] sm:$0xff]  ;;  %v392_v26 = vld [vmem:[#allocation3] sm:$0xff] }
  0x31   : > { %606 = vmatmul.mubr.msk.f32.vlgmr.msra.gmra.mrb[0].mxu0 %vm284_vm0, %v281_v6 }
  0x32   : > { %v589_v17 = vmin.u32 %v376_v14, %v374_v12 }
  0x34   : > { %vm378_vm4 = vcmp.ne.s32.totalorder %v589_v17, 0  ;;  %vm379_vm5 = vcmp.ne.s32.totalorder %v589_v17, 8 }
  0x35   : > { %vm380_vm6 = vmand %vm378_vm4, %vm379_vm5 }
 0x104   : > { %v360_v13 = vpop.f32.mrb[0].mxu0 }
 0x105   : > { %v381_v15 = vmul.f32 1.442695, %v360_v13  ;;  %v607_v16 = vpop.f32.mrb[1].mxu0 }
 0x107   : > { %676 = vpow2.f32 %v381_v15 }
 0x111   : > { %v677_v18 = vpop.eup %676 }
 0x112   : > { %v383_v19 = vsel %vm380_vm6, %v677_v18, 0.0 }
 0x113   : > { %v386_v20 = vsel %vm385_vm7, %v383_v19, 0.0  ;;  %v393_v21 = vmul.f32 %v383_v19, %v383_v19 }
 0x114   : > { %387 = vadd.xlane.f32.xlu0 %v386_v20 }
 0x115   : > { %v394_v22 = vsel %vm385_vm7, %v393_v21, 0.0 }
 0x118   : > { %395 = vadd.xlane.f32.xlu0 %v394_v22 }
 0x1a1   : > { %v388_v24 = vpop.xlane.xlu0 %387 }
 0x1a2   : > { %v389_v25 = vadd.f32 %v388_v24, %v384_v23 }
 0x1a4   : > { %391 = vst.msk [vmem:[#allocation2] sm:$0xff] %vm277_vm1, %v389_v25 }
 0x1a5   : > { %v396_v27 = vpop.xlane.xlu0 %395 }
 0x1a6   : > { %v397_v28 = vadd.f32 %v396_v27, %v392_v26 }
 0x1a8   : > { %398 = vst.msk [vmem:[#allocation3] sm:$0xff] %vm277_vm1, %v397_v28 }
 0x1a9 PF: > { %403 = sbr.rel (!%p269_p3) target bundleno = 673 (0x2a1), region = 48  ;;  %v405_v29 = vld [vmem:[%s267_s29] sm:$0xff] (%p269_p3)  ;;  %vm418_vm8 = vcmask (%p269_p3), 7168   ;;  %v439_v59 = vlaneseq (%p269_p3) }
 0x1aa   : > { %v406_v31 = vmul.f32 (%p269_p3), 1.442695, %v405_v29  ;;  %v404_v40 = vld [vmem:[%s263_s21] sm:$0xff] (%p269_p3) }
 0x1ab   : > { %v408_v30 = vld [vmem:[#allocation2] sm:$0xff] (%p269_p3)  ;;  %v429_v44 = vsel (%p269_p3), %vm418_vm8, %v404_v40, 0.0  ;;  %v440_v60 = vand.u32 (%p269_p3), 127, %v439_v59 }
 0x1ac   : > { %678 = vrcp.f32 (%p269_p3), %v408_v30 }
 0x1ad   : > { %680 = vpow2.f32 (%p269_p3), %v406_v31  ;;  %vm442_vm9 = vcmp.eq.s32.totalorder (%p269_p3), %v440_v60, 1  ;;  %vm441_vm10 = vcmp.eq.s32.totalorder (%p269_p3), %v440_v60, 0 }
 0x1af   : > { %v409_v32 = vld [vmem:[#allocation3] sm:$0xff] (%p269_p3) }
 0x1b0   : > { %v410_v33 = vmul.f32 14.0, %v409_v32 }
 0x1b6   : > { %v679_v34 = vpop.eup %678 }
 0x1b7   : > { %v412_v35 = vmul.f32 %v679_v34, %v410_v33  ;;  %v681_v36 = vpop.eup %680 }
 0x1b9   : > { %v413_v37 = vadd.f32 %v681_v36, %v412_v35 }
 0x1bb   : > { %682 = vlog2.f32 %v413_v37 }
 0x1c5   : > { %v683_v38 = vpop.eup %682 }
 0x1c6   : > { %v415_v39 = vmul.f32 0.6931472, %v683_v38 }
 0x1c8   : > { %v416_v41 = vsub.f32 %v415_v39, %v405_v29 }
 0x1ca   : > { %v417_v42 = vmul.f32 %v416_v41, %v404_v40 }
 0x1cc   : > { %v419_v43 = vsel %vm418_vm8, %v417_v42, 0.0 }
 0x1cd   : > { %420 = vadd.xlane.f32.xlu0 %v419_v43 }
 0x1d1   : > { %430 = vadd.xlane.f32.xlu0 %v429_v44 }
 0x25a   : > { %v421_v45 = vpop.xlane.xlu0 %420 }
 0x25b   : > { %v422_v46 = vrot.slane %v421_v45, 4 }
 0x25d   : > { %v423_v47 = vadd.f32 %v422_v46, %v421_v45 }
 0x25e   : > { %v431_v48 = vpop.xlane.xlu0 %430 }
 0x25f   : > { %v424_v49 = vrot.slane %v423_v47, 2  ;;  %v432_v50 = vrot.slane %v431_v48, 4 }
 0x261   : > { %v433_v51 = vadd.f32 %v432_v50, %v431_v48  ;;  %v425_v52 = vadd.f32 %v424_v49, %v423_v47 }
 0x263   : > { %v434_v53 = vrot.slane %v433_v51, 2  ;;  %v426_v54 = vrot.slane %v425_v52, 1 }
 0x265   : > { %v435_v55 = vadd.f32 %v434_v53, %v433_v51  ;;  %v427_v56 = vadd.f32 %v426_v54, %v425_v52 }
 0x267   : > { %612 = vpush %v427_v56  ;;  %v436_v57 = vrot.slane %v435_v55, 1 }
 0x269   : > { %v437_v58 = vadd.f32 %v436_v57, %v435_v55 }
 0x26b   : > { %614 = vpush %v437_v58 }
 0x298   : > { %s613_s15 = spop %612 }
 0x299   : > { %v445_v62 = vstv %s613_s15 }
 0x29c   : > { %s615_s21 = spop %614 }
 0x29d   : > { %v443_v61 = vstv %s615_s21 }
 0x29e   : > { %v444_v63 = vsel %vm442_vm9, %v443_v61, 0.0 }
 0x29f   : > { %v446_v0 = vsel %vm441_vm10, %v445_v62, %v444_v63 }
 0x2a0   : > { %447 = vst [vmem:[%s895_s6] sm:$0xff] %v446_v0 }
 0x2a1 PF: > { %452 = sbr.rel (!%p584_p4) target bundleno = 680 (0x2a8), region = 52  ;;  %v782_v1 = vmov (%p584_p4), 0.0  }
 0x2a2   : > { %453 = vst [vmem:[%s895_s6] sm:$0xff] (%p584_p4), %v782_v1 }
 0x2a8 PF: > { %s593_s28 = sshll.u32 %s768_s25, 7  ;;  %s468_s16 = sshll.u32 %s895_s6, 4  ;;  %s469_s16 = int_to_ptr.vmem [resolvable:$true] %s468_s16 }
 0x2a9   : > { %s931_s14 = scalar_lea.hbm %s980_s5, %s593_s28  ;;  %s455_s17 = scalar_lea.sflag [#allocation7], %s247_s11 }
 0x2aa   : > { %s696_s13 = scalar_lea.vmem %s469_s16, 128  ;;  %s783_s12 = smov [#allocation6]  }
 0x2ab   : > { %p697_p5 = scmp.ne.s32.totalorder %s469_s16, %s696_s13  ;;  %s700_s18 = sshll.u32 %s783_s12, 4  ;;  %s701_s18 = int_to_ptr.vmem [resolvable:$false] %s700_s18 }
 0x2ac   : > { %s702_s19 = scalar_lea.vmem %s701_s18, 256  ;;  %p703_p8 = scmp.lt.s32.totalorder %s469_s16, %s701_s18 }
 0x2ad   : > { %p698_p6 = pnand %p697_p5, %p857_p9  ;;  %p704_p10 = scmp.lt.s32.totalorder %s702_s19, %s696_s13 }
 0x2af   : > { %p699_p7 = pneg %p698_p6  ;;  %p705_p11 = por %p704_p10, %p703_p8 }
 0x2b1   : > { %p706_p12 = pnand %p705_p11, %p699_p7 }
 0x2b3   : > { %709 = shalt.err (!%p706_p12)
}
 0x2b4   : > { %s710_s25 = scalar_lea.hbm %s931_s14, 128  ;;  %s714_s20 = scalar_lea.hbm %s980_s5, 256 }
 0x2b5   : > { %p711_p0 = scmp.ne.s32.totalorder %s931_s14, %s710_s25  ;;  %p715_p3 = scmp.lt.u32.totalorder %s931_s14, %s980_s5 }
 0x2b6   : > { %p716_p4 = scmp.lt.u32.totalorder %s714_s20, %s710_s25  ;;  %p718_p6 = scmp.lt.u32.totalorder %s710_s25, %s931_s14 }
 0x2b7   : > { %p712_p1 = pnand %p711_p0, %p857_p9 }
 0x2b8   : > { %p717_p5 = por %p716_p4, %p715_p3 }
 0x2b9   : > { %p713_p2 = pneg %p712_p1 }
 0x2ba   : > { %p719_p7 = por %p718_p6, %p717_p5 }
 0x2bc   : > { %p720_p8 = pnand %p719_p7, %p713_p2 }
 0x2be   : > { %723 = shalt.err (!%p720_p8)
}
 0x2bf   : > { %616 = dma.vmem_to_hbm [thread:$0]  (%p857_p9), %s469_s16, 128, %s931_s14, %s455_s17  }
 0x2c0 PF: > { %p622_p10 = scmp.ge.s32.totalorder %s776_s27, 2  ;;  %s480_s21 = sand.u32 1, %s756_s23  }
 0x2c1   : > { %s481_s28 = scalar_lea.sflag [#allocation7], %s480_s21 }
 0x2c2   : > { %p619_p11 = pnand %p622_p10, %p864_p13 }
 0x2c4   : > { %751 = dma.done.wait (!%p619_p11), %s481_s28, 128  }
 0x2c5   : > { %753 = vsyncadd (!%p619_p11), %s481_s28, 4294967168  ;;  %s24_s27 = sadd.s32 1, %s776_s27   ;;  %s983_s23 = smov %s760_s24 }
 0x2c6   : > { %p21_p12 = scmp.ge.s32.totalorder %s24_s27, 4   ;;  %s984_s24 = smov %s764_s0 }
 0x2c7   : > { %s985_s0 = smov %s870_s10  ;;  %s986_s25 = smov %s772_s26 }
 0x2c8   : > { %s987_s26 = smov %s989_s30  ;;  %23 = sbr.rel (!%p21_p12) target bundleno = 19 (0x13), region = 96 }
 0x2cf   :  { %486 = vsyncpa [#allocation7], 1 }
 0x2d0   :  { %488 = vsyncpa [#allocation7 + $0x1], 1 }

</bundles_post_ra>
